<compile_context>
chip_gen: v7x
topology: tpu7x:2x2x1
jax: 0.10.0
libtpu: 0.0.40
codegen_flags: <defaults>
</compile_context>

<pallas_src>
import jax
import jax.numpy as jnp
from jax.experimental import pallas as pl
from jax.experimental.pallas import tpu as pltpu

# ----------------------------- config (small) -----------------------------
B = 2          # batch
T = 8          # sequence length
D = 32         # hidden_size
H = 4          # num_attention_heads
HD = D // H    # head_dim
FFN = 128      # ffn_dim
LN_EPS = 1e-5
SCALING = HD ** (-0.5)
COMPUTE_DTYPE = jnp.bfloat16   # MXU operand dtype; accumulation stays f32


def _layer_norm(x, gamma, beta):
    # PyTorch LayerNorm: biased variance over the last dim, f32 math.
    mu = jnp.mean(x, axis=-1, keepdims=True)
    var = jnp.mean((x - mu) ** 2, axis=-1, keepdims=True)
    return (x - mu) * jax.lax.rsqrt(var + LN_EPS) * gamma + beta


def decoder_layer_kernel(
    x_ref, mask_ref,
    wqkv_ref, bqkv_ref, wo_ref, bo_ref,
    ln1_g_ref, ln1_b_ref, ln2_g_ref, ln2_b_ref,
    w1_ref, b1_ref, w2_ref, b2_ref,
    out_ref,
):
    cdt = wqkv_ref.dtype               # matmul operand dtype (bf16)

    x = x_ref[0]                       # (T, D) f32, this batch's tokens
    mask = mask_ref[0, 0]              # (T, T) additive mask (finite)

    residual = x
    xn = _layer_norm(x, ln1_g_ref[...], ln1_b_ref[...])

    # ---- fused QKV projection: ONE (T,D)@(D,3D) matmul --------------------
    # Attention scaling is already folded into the Q columns of w_qkv / b_qkv.
    qkv = jnp.dot(xn.astype(cdt), wqkv_ref[...],
                  preferred_element_type=jnp.float32) + bqkv_ref[...]  # (T,3D)

    # ---- per-head attention (small (T,T) tiles; softmax in f32) -----------
    # TODO(synk): attention_dropout / dropout are identity in eval mode.
    ctx_heads = []
    for h in range(H):
        q_h = qkv[:, h * HD:(h + 1) * HD].astype(cdt)                  # (T,HD)
        k_h = qkv[:, D + h * HD:D + (h + 1) * HD].astype(cdt)          # (T,HD)
        v_h = qkv[:, 2 * D + h * HD:2 * D + (h + 1) * HD].astype(cdt)  # (T,HD)

        # s = q @ k^T  (contraction over head_dim), f32 accumulate, + mask.
        s = jax.lax.dot_general(
            q_h, k_h, (((1,), (1,)), ((), ())),
            preferred_element_type=jnp.float32) + mask                 # (T,T)
        s = s - jnp.max(s, axis=-1, keepdims=True)
        e = jnp.exp(s)
        p = e / jnp.sum(e, axis=-1, keepdims=True)                     # exact

        ctx_heads.append(jnp.dot(p.astype(cdt), v_h,
                                 preferred_element_type=jnp.float32))  # (T,HD)

    # ---- out-projection: head reduction fused into ONE (T,D)@(D,D) matmul -
    ctx = jnp.concatenate(ctx_heads, axis=-1)                          # (T,D)
    attn = jnp.dot(ctx.astype(cdt), wo_ref[...],
                   preferred_element_type=jnp.float32) + bo_ref[...]

    h1 = residual + attn

    # ---- FFN block ---------------------------------------------------------
    h2 = _layer_norm(h1, ln2_g_ref[...], ln2_b_ref[...])
    f = jnp.dot(h2.astype(cdt), w1_ref[...],
                preferred_element_type=jnp.float32) + b1_ref[...]      # (T,FFN)
    f = jnp.maximum(f, 0.0)                                            # relu
    f = jnp.dot(f.astype(cdt), w2_ref[...],
                preferred_element_type=jnp.float32) + b2_ref[...]      # (T,D)

    out_ref[0] = h1 + f


def prepare_params(params, compute_dtype=COMPUTE_DTYPE):
    """One-time weight packing, hoisted out of the per-call path.

    * concat wq|wk|wv -> (D, 3D) (scaling folded into the Q slab)
    * cast all matmul weights to bf16 once; biases / LN params stay f32.
    """
    w_qkv = jnp.concatenate(
        [params["wq"] * SCALING, params["wk"], params["wv"]], axis=1)
    b_qkv = jnp.concatenate(
        [params["bq"] * SCALING, params["bk"], params["bv"]], axis=1)
    return {
        "w_qkv": w_qkv.astype(compute_dtype),
        "b_qkv": b_qkv.astype(jnp.float32),
        "wo": params["wo"].astype(compute_dtype),
        "bo": params["bo"],
        "ln1_g": params["ln1_g"], "ln1_b": params["ln1_b"],
        "ln2_g": params["ln2_g"], "ln2_b": params["ln2_b"],
        "w1": params["w1"].astype(compute_dtype), "b1": params["b1"],
        "w2": params["w2"].astype(compute_dtype), "b2": params["b2"],
    }


def mpt_decoder_layer(x, attention_mask, prepped):
    """x: (B, T, D) f32; attention_mask: (B, 1, T, T) additive (finite);
    prepped: output of prepare_params().  Grid = one batch per step, marked
    "parallel" so the two TensorCores of a v7x chip each take a batch."""
    Bx, Tx, Dx = x.shape
    Fx = prepped["w1"].shape[1]

    const = lambda shape: pl.BlockSpec(shape, lambda b, _s=len(shape): (0,) * _s)
    in_specs = [
        pl.BlockSpec((1, Tx, Dx), lambda b: (b, 0, 0)),        # x (per batch)
        pl.BlockSpec((1, 1, Tx, Tx), lambda b: (b, 0, 0, 0)),  # mask (per batch)
        const((Dx, 3 * Dx)), const((1, 3 * Dx)),               # w_qkv, b_qkv
        const((Dx, Dx)), const((1, Dx)),                       # wo, bo
        const((1, Dx)), const((1, Dx)),                        # ln1 gamma, beta
        const((1, Dx)), const((1, Dx)),                        # ln2 gamma, beta
        const((Dx, Fx)), const((1, Fx)),                       # w1, b1
        const((Fx, Dx)), const((1, Dx)),                       # w2, b2
    ]
    out_spec = pl.BlockSpec((1, Tx, Dx), lambda b: (b, 0, 0))

    return pl.pallas_call(
        decoder_layer_kernel,
        out_shape=jax.ShapeDtypeStruct((Bx, Tx, Dx), jnp.float32),
        grid_spec=pltpu.PrefetchScalarGridSpec(
            num_scalar_prefetch=0,
            grid=(Bx,),
            in_specs=in_specs,
            out_specs=out_spec,
        ),
        compiler_params=pltpu.CompilerParams(
            dimension_semantics=("parallel",)),
    )(
        x, attention_mask,
        prepped["w_qkv"], prepped["b_qkv"], prepped["wo"], prepped["bo"],
        prepped["ln1_g"], prepped["ln1_b"], prepped["ln2_g"], prepped["ln2_b"],
        prepped["w1"], prepped["b1"], prepped["w2"], prepped["b2"],
    )


def reference(x, mask, p):
    """Pure-JAX f32 reference mirroring the PyTorch forward exactly."""
    def ln(v, g, b):
        mu = jnp.mean(v, axis=-1, keepdims=True)
        var = jnp.mean((v - mu) ** 2, axis=-1, keepdims=True)
        return (v - mu) / jnp.sqrt(var + LN_EPS) * g + b

    residual = x
    xn = ln(x, p["ln1_g"], p["ln1_b"])
    q = (xn @ p["wq"] + p["bq"]) * SCALING
    k = xn @ p["wk"] + p["bk"]
    v = xn @ p["wv"] + p["bv"]
    qh = q.reshape(B, T, H, HD).transpose(0, 2, 1, 3)
    kh = k.reshape(B, T, H, HD).transpose(0, 2, 1, 3)
    vh = v.reshape(B, T, H, HD).transpose(0, 2, 1, 3)
    s = jnp.einsum("bhqd,bhkd->bhqk", qh, kh) + mask
    s = jnp.maximum(s, jnp.finfo(jnp.float32).min)
    s = jax.nn.softmax(s, axis=-1)
    a = jnp.einsum("bhqk,bhkd->bhqd", s, vh)
    a = a.transpose(0, 2, 1, 3).reshape(B, T, D)
    a = a @ p["wo"] + p["bo"]
    h1 = residual + a
    h2 = ln(h1, p["ln2_g"], p["ln2_b"])
    f = jnp.maximum(h2 @ p["w1"] + p["b1"], 0.0)
    f = f @ p["w2"] + p["b2"]
    return h1 + f


def init_params(key):
    ks = jax.random.split(key, 8)
    scale = 0.05
    return {
        "wq": scale * jax.random.normal(ks[0], (D, D), jnp.float32),
        "wk": scale * jax.random.normal(ks[1], (D, D), jnp.float32),
        "wv": scale * jax.random.normal(ks[2], (D, D), jnp.float32),
        "wo": scale * jax.random.normal(ks[3], (D, D), jnp.float32),
        "bq": 0.01 * jnp.ones((1, D), jnp.float32),
        "bk": -0.01 * jnp.ones((1, D), jnp.float32),
        "bv": 0.02 * jnp.ones((1, D), jnp.float32),
        "bo": jnp.zeros((1, D), jnp.float32),
        "ln1_g": jnp.ones((1, D), jnp.float32),
        "ln1_b": jnp.zeros((1, D), jnp.float32),
        "ln2_g": jnp.ones((1, D), jnp.float32),
        "ln2_b": jnp.zeros((1, D), jnp.float32),
        "w1": scale * jax.random.normal(ks[4], (D, FFN), jnp.float32),
        "b1": 0.01 * jnp.ones((1, FFN), jnp.float32),
        "w2": scale * jax.random.normal(ks[5], (FFN, D), jnp.float32),
        "b2": jnp.zeros((1, D), jnp.float32),
    }


if __name__ == "__main__":
    key = jax.random.PRNGKey(0)
    kx, kp = jax.random.split(key)
    x = jax.random.normal(kx, (B, T, D), jnp.float32)
    # Additive causal mask broadcast over heads -> (B, 1, T, T); finite values
    # only, and no row is fully masked (diagonal stays 0).
    causal = jnp.where(jnp.tril(jnp.ones((T, T), jnp.float32)) > 0, 0.0, -1e9)
    mask = jnp.broadcast_to(causal, (B, 1, T, T))

    params = init_params(kp)
    prepped = prepare_params(params)        # one-time weight packing (hoisted)

    out = mpt_decoder_layer(x, mask, prepped)
    out = jax.block_until_ready(out)

    ref = reference(x, mask, params)
    assert out.shape == (B, T, D)
    max_err = float(jnp.max(jnp.abs(out - ref)))
    # Tolerance reflects bf16 MXU operands (weights + activations); softmax,
    # LayerNorm, accumulation and residuals are exact f32.
    assert jnp.allclose(out, ref, atol=3e-2, rtol=3e-2), max_err
    print("KERNEL_OK")
</pallas_src>

<mosaic_0001>
module attributes {stable_mosaic.version = 11 : i64} {
  func.func @decoder_layer_kernel(%arg0: i32, %arg1: memref<1x8x32xf32, #tpu.memory_space<vmem>>, %arg2: memref<1x1x8x8xf32, #tpu.memory_space<vmem>>, %arg3: memref<32x96xbf16, #tpu.memory_space<vmem>>, %arg4: memref<1x96xf32, #tpu.memory_space<vmem>>, %arg5: memref<32x32xbf16, #tpu.memory_space<vmem>>, %arg6: memref<1x32xf32, #tpu.memory_space<vmem>>, %arg7: memref<1x32xf32, #tpu.memory_space<vmem>>, %arg8: memref<1x32xf32, #tpu.memory_space<vmem>>, %arg9: memref<1x32xf32, #tpu.memory_space<vmem>>, %arg10: memref<1x32xf32, #tpu.memory_space<vmem>>, %arg11: memref<32x128xbf16, #tpu.memory_space<vmem>>, %arg12: memref<1x128xf32, #tpu.memory_space<vmem>>, %arg13: memref<128x32xbf16, #tpu.memory_space<vmem>>, %arg14: memref<1x32xf32, #tpu.memory_space<vmem>>, %arg15: memref<1x8x32xf32, #tpu.memory_space<vmem>>) attributes {dimension_semantics = [#tpu.dimension_semantics<parallel>], iteration_bounds = array<i64: 2>, scalar_prefetch = 0 : i64, scratch_operands = 0 : i64, tpu.core_type = #tpu.core_type<tc>, window_params = [{transform_indices = @transform_0, window_bounds = array<i64: 1, 8, 32>}, {transform_indices = @transform_1, window_bounds = array<i64: 1, 1, 8, 8>}, {pipeline_mode = #tpu.pipeline_mode<synchronous>, transform_indices = @transform_2, window_bounds = array<i64: 32, 96>}, {pipeline_mode = #tpu.pipeline_mode<synchronous>, transform_indices = @transform_3, window_bounds = array<i64: 1, 96>}, {pipeline_mode = #tpu.pipeline_mode<synchronous>, transform_indices = @transform_4, window_bounds = array<i64: 32, 32>}, {pipeline_mode = #tpu.pipeline_mode<synchronous>, transform_indices = @transform_5, window_bounds = array<i64: 1, 32>}, {pipeline_mode = #tpu.pipeline_mode<synchronous>, transform_indices = @transform_6, window_bounds = array<i64: 1, 32>}, {pipeline_mode = #tpu.pipeline_mode<synchronous>, transform_indices = @transform_7, window_bounds = array<i64: 1, 32>}, {pipeline_mode = #tpu.pipeline_mode<synchronous>, transform_indices = @transform_8, window_bounds = array<i64: 1, 32>}, {pipeline_mode = #tpu.pipeline_mode<synchronous>, transform_indices = @transform_9, window_bounds = array<i64: 1, 32>}, {pipeline_mode = #tpu.pipeline_mode<synchronous>, transform_indices = @transform_10, window_bounds = array<i64: 32, 128>}, {pipeline_mode = #tpu.pipeline_mode<synchronous>, transform_indices = @transform_11, window_bounds = array<i64: 1, 128>}, {pipeline_mode = #tpu.pipeline_mode<synchronous>, transform_indices = @transform_12, window_bounds = array<i64: 128, 32>}, {pipeline_mode = #tpu.pipeline_mode<synchronous>, transform_indices = @transform_13, window_bounds = array<i64: 1, 32>}, {transform_indices = @transform_14, window_bounds = array<i64: 1, 8, 32>}]} {
    %c0 = arith.constant 0 : index
    %c0_0 = arith.constant 0 : index
    %c0_1 = arith.constant 0 : index
    %0 = vector.load %arg1[%c0, %c0_0, %c0_1] : memref<1x8x32xf32, #tpu.memory_space<vmem>>, vector<1x8x32xf32>
    %1 = vector.shape_cast %0 : vector<1x8x32xf32> to vector<8x32xf32>
    %c0_2 = arith.constant 0 : index
    %c0_3 = arith.constant 0 : index
    %c0_4 = arith.constant 0 : index
    %c0_5 = arith.constant 0 : index
    %2 = vector.load %arg2[%c0_2, %c0_3, %c0_4, %c0_5] : memref<1x1x8x8xf32, #tpu.memory_space<vmem>>, vector<1x1x8x8xf32>
    %3 = vector.shape_cast %2 : vector<1x1x8x8xf32> to vector<8x8xf32>
    %c0_6 = arith.constant 0 : index
    %c0_7 = arith.constant 0 : index
    %4 = vector.load %arg7[%c0_6, %c0_7] : memref<1x32xf32, #tpu.memory_space<vmem>>, vector<1x32xf32>
    %c0_8 = arith.constant 0 : index
    %c0_9 = arith.constant 0 : index
    %5 = vector.load %arg8[%c0_8, %c0_9] : memref<1x32xf32, #tpu.memory_space<vmem>>, vector<1x32xf32>
    %cst = arith.constant dense<0.000000e+00> : vector<8xf32>
    %6 = vector.multi_reduction <add>, %1, %cst [1] : vector<8x32xf32> to vector<8xf32>
    %7 = vector.shape_cast %6 : vector<8xf32> to vector<8x1xf32>
    %cst_10 = arith.constant 3.200000e+01 : f32
    %8 = vector.broadcast %cst_10 : f32 to vector<8x1xf32>
    %9 = arith.divf %7, %8 : vector<8x1xf32>
    %10 = vector.broadcast %9 : vector<8x1xf32> to vector<8x32xf32>
    %11 = arith.subf %1, %10 : vector<8x32xf32>
    %12 = arith.mulf %11, %11 : vector<8x32xf32>
    %cst_11 = arith.constant dense<0.000000e+00> : vector<8xf32>
    %13 = vector.multi_reduction <add>, %12, %cst_11 [1] : vector<8x32xf32> to vector<8xf32>
    %14 = vector.shape_cast %13 : vector<8xf32> to vector<8x1xf32>
    %cst_12 = arith.constant 3.200000e+01 : f32
    %15 = vector.broadcast %cst_12 : f32 to vector<8x1xf32>
    %16 = arith.divf %14, %15 : vector<8x1xf32>
    %17 = vector.broadcast %9 : vector<8x1xf32> to vector<8x32xf32>
    %18 = arith.subf %1, %17 : vector<8x32xf32>
    %cst_13 = arith.constant 9.99999974E-6 : f32
    %19 = vector.broadcast %cst_13 : f32 to vector<8x1xf32>
    %20 = arith.addf %16, %19 : vector<8x1xf32>
    %21 = math.rsqrt %20 : vector<8x1xf32>
    %22 = vector.broadcast %21 : vector<8x1xf32> to vector<8x32xf32>
    %23 = arith.mulf %18, %22 : vector<8x32xf32>
    %24 = vector.broadcast %4 : vector<1x32xf32> to vector<8x32xf32>
    %25 = arith.mulf %23, %24 : vector<8x32xf32>
    %26 = vector.broadcast %5 : vector<1x32xf32> to vector<8x32xf32>
    %27 = arith.addf %25, %26 : vector<8x32xf32>
    %28 = arith.truncf %27 : vector<8x32xf32> to vector<8x32xbf16>
    %c0_14 = arith.constant 0 : index
    %c0_15 = arith.constant 0 : index
    %29 = vector.load %arg3[%c0_14, %c0_15] : memref<32x96xbf16, #tpu.memory_space<vmem>>, vector<32x96xbf16>
    %cst_16 = arith.constant dense<0.000000e+00> : vector<8x96xf32>
    %30 = tpu.matmul %28, %29, %cst_16 {dimension_numbers = #tpu.dot_dimension_numbers<[1], [0], [0], [1], [0, 0, 1, 1], [], []>} : vector<8x32xbf16>, vector<32x96xbf16>, vector<8x96xf32> -> vector<8x96xf32>
    %c0_17 = arith.constant 0 : index
    %c0_18 = arith.constant 0 : index
    %31 = vector.load %arg4[%c0_17, %c0_18] : memref<1x96xf32, #tpu.memory_space<vmem>>, vector<1x96xf32>
    %32 = vector.broadcast %31 : vector<1x96xf32> to vector<8x96xf32>
    %33 = arith.addf %30, %32 : vector<8x96xf32>
    %34 = vector.extract_strided_slice %33 {offsets = [0, 0], sizes = [8, 8], strides = [1, 1]} : vector<8x96xf32> to vector<8x8xf32>
    %35 = arith.truncf %34 : vector<8x8xf32> to vector<8x8xbf16>
    %36 = vector.extract_strided_slice %33 {offsets = [0, 32], sizes = [8, 8], strides = [1, 1]} : vector<8x96xf32> to vector<8x8xf32>
    %37 = arith.truncf %36 : vector<8x8xf32> to vector<8x8xbf16>
    %38 = vector.extract_strided_slice %33 {offsets = [0, 64], sizes = [8, 8], strides = [1, 1]} : vector<8x96xf32> to vector<8x8xf32>
    %39 = arith.truncf %38 : vector<8x8xf32> to vector<8x8xbf16>
    %cst_19 = arith.constant dense<0.000000e+00> : vector<8x8xf32>
    %40 = tpu.matmul %35, %37, %cst_19 {dimension_numbers = #tpu.dot_dimension_numbers<[1], [1], [0], [0], [0, 0, 1, 0], [], []>} : vector<8x8xbf16>, vector<8x8xbf16>, vector<8x8xf32> -> vector<8x8xf32>
    %41 = arith.addf %40, %3 : vector<8x8xf32>
    %cst_20 = arith.constant dense<0xFF800000> : vector<8xf32>
    %42 = vector.multi_reduction <maximumf>, %41, %cst_20 [1] : vector<8x8xf32> to vector<8xf32>
    %43 = vector.shape_cast %42 : vector<8xf32> to vector<8x1xf32>
    %44 = vector.broadcast %43 : vector<8x1xf32> to vector<8x8xf32>
    %45 = arith.subf %41, %44 : vector<8x8xf32>
    %46 = math.exp %45 : vector<8x8xf32>
    %cst_21 = arith.constant dense<0.000000e+00> : vector<8xf32>
    %47 = vector.multi_reduction <add>, %46, %cst_21 [1] : vector<8x8xf32> to vector<8xf32>
    %48 = vector.shape_cast %47 : vector<8xf32> to vector<8x1xf32>
    %49 = vector.broadcast %48 : vector<8x1xf32> to vector<8x8xf32>
    %50 = arith.divf %46, %49 : vector<8x8xf32>
    %51 = arith.truncf %50 : vector<8x8xf32> to vector<8x8xbf16>
    %cst_22 = arith.constant dense<0.000000e+00> : vector<8x8xf32>
    %52 = tpu.matmul %51, %39, %cst_22 {dimension_numbers = #tpu.dot_dimension_numbers<[1], [0], [0], [1], [0, 0, 1, 1], [], []>} : vector<8x8xbf16>, vector<8x8xbf16>, vector<8x8xf32> -> vector<8x8xf32>
    %53 = vector.extract_strided_slice %33 {offsets = [0, 8], sizes = [8, 8], strides = [1, 1]} : vector<8x96xf32> to vector<8x8xf32>
    %54 = arith.truncf %53 : vector<8x8xf32> to vector<8x8xbf16>
    %55 = vector.extract_strided_slice %33 {offsets = [0, 40], sizes = [8, 8], strides = [1, 1]} : vector<8x96xf32> to vector<8x8xf32>
    %56 = arith.truncf %55 : vector<8x8xf32> to vector<8x8xbf16>
    %57 = vector.extract_strided_slice %33 {offsets = [0, 72], sizes = [8, 8], strides = [1, 1]} : vector<8x96xf32> to vector<8x8xf32>
    %58 = arith.truncf %57 : vector<8x8xf32> to vector<8x8xbf16>
    %cst_23 = arith.constant dense<0.000000e+00> : vector<8x8xf32>
    %59 = tpu.matmul %54, %56, %cst_23 {dimension_numbers = #tpu.dot_dimension_numbers<[1], [1], [0], [0], [0, 0, 1, 0], [], []>} : vector<8x8xbf16>, vector<8x8xbf16>, vector<8x8xf32> -> vector<8x8xf32>
    %60 = arith.addf %59, %3 : vector<8x8xf32>
    %cst_24 = arith.constant dense<0xFF800000> : vector<8xf32>
    %61 = vector.multi_reduction <maximumf>, %60, %cst_24 [1] : vector<8x8xf32> to vector<8xf32>
    %62 = vector.shape_cast %61 : vector<8xf32> to vector<8x1xf32>
    %63 = vector.broadcast %62 : vector<8x1xf32> to vector<8x8xf32>
    %64 = arith.subf %60, %63 : vector<8x8xf32>
    %65 = math.exp %64 : vector<8x8xf32>
    %cst_25 = arith.constant dense<0.000000e+00> : vector<8xf32>
    %66 = vector.multi_reduction <add>, %65, %cst_25 [1] : vector<8x8xf32> to vector<8xf32>
    %67 = vector.shape_cast %66 : vector<8xf32> to vector<8x1xf32>
    %68 = vector.broadcast %67 : vector<8x1xf32> to vector<8x8xf32>
    %69 = arith.divf %65, %68 : vector<8x8xf32>
    %70 = arith.truncf %69 : vector<8x8xf32> to vector<8x8xbf16>
    %cst_26 = arith.constant dense<0.000000e+00> : vector<8x8xf32>
    %71 = tpu.matmul %70, %58, %cst_26 {dimension_numbers = #tpu.dot_dimension_numbers<[1], [0], [0], [1], [0, 0, 1, 1], [], []>} : vector<8x8xbf16>, vector<8x8xbf16>, vector<8x8xf32> -> vector<8x8xf32>
    %72 = vector.extract_strided_slice %33 {offsets = [0, 16], sizes = [8, 8], strides = [1, 1]} : vector<8x96xf32> to vector<8x8xf32>
    %73 = arith.truncf %72 : vector<8x8xf32> to vector<8x8xbf16>
    %74 = vector.extract_strided_slice %33 {offsets = [0, 48], sizes = [8, 8], strides = [1, 1]} : vector<8x96xf32> to vector<8x8xf32>
    %75 = arith.truncf %74 : vector<8x8xf32> to vector<8x8xbf16>
    %76 = vector.extract_strided_slice %33 {offsets = [0, 80], sizes = [8, 8], strides = [1, 1]} : vector<8x96xf32> to vector<8x8xf32>
    %77 = arith.truncf %76 : vector<8x8xf32> to vector<8x8xbf16>
    %cst_27 = arith.constant dense<0.000000e+00> : vector<8x8xf32>
    %78 = tpu.matmul %73, %75, %cst_27 {dimension_numbers = #tpu.dot_dimension_numbers<[1], [1], [0], [0], [0, 0, 1, 0], [], []>} : vector<8x8xbf16>, vector<8x8xbf16>, vector<8x8xf32> -> vector<8x8xf32>
    %79 = arith.addf %78, %3 : vector<8x8xf32>
    %cst_28 = arith.constant dense<0xFF800000> : vector<8xf32>
    %80 = vector.multi_reduction <maximumf>, %79, %cst_28 [1] : vector<8x8xf32> to vector<8xf32>
    %81 = vector.shape_cast %80 : vector<8xf32> to vector<8x1xf32>
    %82 = vector.broadcast %81 : vector<8x1xf32> to vector<8x8xf32>
    %83 = arith.subf %79, %82 : vector<8x8xf32>
    %84 = math.exp %83 : vector<8x8xf32>
    %cst_29 = arith.constant dense<0.000000e+00> : vector<8xf32>
    %85 = vector.multi_reduction <add>, %84, %cst_29 [1] : vector<8x8xf32> to vector<8xf32>
    %86 = vector.shape_cast %85 : vector<8xf32> to vector<8x1xf32>
    %87 = vector.broadcast %86 : vector<8x1xf32> to vector<8x8xf32>
    %88 = arith.divf %84, %87 : vector<8x8xf32>
    %89 = arith.truncf %88 : vector<8x8xf32> to vector<8x8xbf16>
    %cst_30 = arith.constant dense<0.000000e+00> : vector<8x8xf32>
    %90 = tpu.matmul %89, %77, %cst_30 {dimension_numbers = #tpu.dot_dimension_numbers<[1], [0], [0], [1], [0, 0, 1, 1], [], []>} : vector<8x8xbf16>, vector<8x8xbf16>, vector<8x8xf32> -> vector<8x8xf32>
    %91 = vector.extract_strided_slice %33 {offsets = [0, 24], sizes = [8, 8], strides = [1, 1]} : vector<8x96xf32> to vector<8x8xf32>
    %92 = arith.truncf %91 : vector<8x8xf32> to vector<8x8xbf16>
    %93 = vector.extract_strided_slice %33 {offsets = [0, 56], sizes = [8, 8], strides = [1, 1]} : vector<8x96xf32> to vector<8x8xf32>
    %94 = arith.truncf %93 : vector<8x8xf32> to vector<8x8xbf16>
    %95 = vector.extract_strided_slice %33 {offsets = [0, 88], sizes = [8, 8], strides = [1, 1]} : vector<8x96xf32> to vector<8x8xf32>
    %96 = arith.truncf %95 : vector<8x8xf32> to vector<8x8xbf16>
    %cst_31 = arith.constant dense<0.000000e+00> : vector<8x8xf32>
    %97 = tpu.matmul %92, %94, %cst_31 {dimension_numbers = #tpu.dot_dimension_numbers<[1], [1], [0], [0], [0, 0, 1, 0], [], []>} : vector<8x8xbf16>, vector<8x8xbf16>, vector<8x8xf32> -> vector<8x8xf32>
    %98 = arith.addf %97, %3 : vector<8x8xf32>
    %cst_32 = arith.constant dense<0xFF800000> : vector<8xf32>
    %99 = vector.multi_reduction <maximumf>, %98, %cst_32 [1] : vector<8x8xf32> to vector<8xf32>
    %100 = vector.shape_cast %99 : vector<8xf32> to vector<8x1xf32>
    %101 = vector.broadcast %100 : vector<8x1xf32> to vector<8x8xf32>
    %102 = arith.subf %98, %101 : vector<8x8xf32>
    %103 = math.exp %102 : vector<8x8xf32>
    %cst_33 = arith.constant dense<0.000000e+00> : vector<8xf32>
    %104 = vector.multi_reduction <add>, %103, %cst_33 [1] : vector<8x8xf32> to vector<8xf32>
    %105 = vector.shape_cast %104 : vector<8xf32> to vector<8x1xf32>
    %106 = vector.broadcast %105 : vector<8x1xf32> to vector<8x8xf32>
    %107 = arith.divf %103, %106 : vector<8x8xf32>
    %108 = arith.truncf %107 : vector<8x8xf32> to vector<8x8xbf16>
    %cst_34 = arith.constant dense<0.000000e+00> : vector<8x8xf32>
    %109 = tpu.matmul %108, %96, %cst_34 {dimension_numbers = #tpu.dot_dimension_numbers<[1], [0], [0], [1], [0, 0, 1, 1], [], []>} : vector<8x8xbf16>, vector<8x8xbf16>, vector<8x8xf32> -> vector<8x8xf32>
    %110 = tpu.concatenate %52, %71, %90, %109 in 1 : vector<8x8xf32>, vector<8x8xf32>, vector<8x8xf32>, vector<8x8xf32> -> vector<8x32xf32>
    %111 = arith.truncf %110 : vector<8x32xf32> to vector<8x32xbf16>
    %c0_35 = arith.constant 0 : index
    %c0_36 = arith.constant 0 : index
    %112 = vector.load %arg5[%c0_35, %c0_36] : memref<32x32xbf16, #tpu.memory_space<vmem>>, vector<32x32xbf16>
    %cst_37 = arith.constant dense<0.000000e+00> : vector<8x32xf32>
    %113 = tpu.matmul %111, %112, %cst_37 {dimension_numbers = #tpu.dot_dimension_numbers<[1], [0], [0], [1], [0, 0, 1, 1], [], []>} : vector<8x32xbf16>, vector<32x32xbf16>, vector<8x32xf32> -> vector<8x32xf32>
    %c0_38 = arith.constant 0 : index
    %c0_39 = arith.constant 0 : index
    %114 = vector.load %arg6[%c0_38, %c0_39] : memref<1x32xf32, #tpu.memory_space<vmem>>, vector<1x32xf32>
    %115 = vector.broadcast %114 : vector<1x32xf32> to vector<8x32xf32>
    %116 = arith.addf %113, %115 : vector<8x32xf32>
    %117 = arith.addf %1, %116 : vector<8x32xf32>
    %c0_40 = arith.constant 0 : index
    %c0_41 = arith.constant 0 : index
    %118 = vector.load %arg9[%c0_40, %c0_41] : memref<1x32xf32, #tpu.memory_space<vmem>>, vector<1x32xf32>
    %c0_42 = arith.constant 0 : index
    %c0_43 = arith.constant 0 : index
    %119 = vector.load %arg10[%c0_42, %c0_43] : memref<1x32xf32, #tpu.memory_space<vmem>>, vector<1x32xf32>
    %cst_44 = arith.constant dense<0.000000e+00> : vector<8xf32>
    %120 = vector.multi_reduction <add>, %117, %cst_44 [1] : vector<8x32xf32> to vector<8xf32>
    %121 = vector.shape_cast %120 : vector<8xf32> to vector<8x1xf32>
    %cst_45 = arith.constant 3.200000e+01 : f32
    %122 = vector.broadcast %cst_45 : f32 to vector<8x1xf32>
    %123 = arith.divf %121, %122 : vector<8x1xf32>
    %124 = vector.broadcast %123 : vector<8x1xf32> to vector<8x32xf32>
    %125 = arith.subf %117, %124 : vector<8x32xf32>
    %126 = arith.mulf %125, %125 : vector<8x32xf32>
    %cst_46 = arith.constant dense<0.000000e+00> : vector<8xf32>
    %127 = vector.multi_reduction <add>, %126, %cst_46 [1] : vector<8x32xf32> to vector<8xf32>
    %128 = vector.shape_cast %127 : vector<8xf32> to vector<8x1xf32>
    %cst_47 = arith.constant 3.200000e+01 : f32
    %129 = vector.broadcast %cst_47 : f32 to vector<8x1xf32>
    %130 = arith.divf %128, %129 : vector<8x1xf32>
    %131 = vector.broadcast %123 : vector<8x1xf32> to vector<8x32xf32>
    %132 = arith.subf %117, %131 : vector<8x32xf32>
    %cst_48 = arith.constant 9.99999974E-6 : f32
    %133 = vector.broadcast %cst_48 : f32 to vector<8x1xf32>
    %134 = arith.addf %130, %133 : vector<8x1xf32>
    %135 = math.rsqrt %134 : vector<8x1xf32>
    %136 = vector.broadcast %135 : vector<8x1xf32> to vector<8x32xf32>
    %137 = arith.mulf %132, %136 : vector<8x32xf32>
    %138 = vector.broadcast %118 : vector<1x32xf32> to vector<8x32xf32>
    %139 = arith.mulf %137, %138 : vector<8x32xf32>
    %140 = vector.broadcast %119 : vector<1x32xf32> to vector<8x32xf32>
    %141 = arith.addf %139, %140 : vector<8x32xf32>
    %142 = arith.truncf %141 : vector<8x32xf32> to vector<8x32xbf16>
    %c0_49 = arith.constant 0 : index
    %c0_50 = arith.constant 0 : index
    %143 = vector.load %arg11[%c0_49, %c0_50] : memref<32x128xbf16, #tpu.memory_space<vmem>>, vector<32x128xbf16>
    %cst_51 = arith.constant dense<0.000000e+00> : vector<8x128xf32>
    %144 = tpu.matmul %142, %143, %cst_51 {dimension_numbers = #tpu.dot_dimension_numbers<[1], [0], [0], [1], [0, 0, 1, 1], [], []>} : vector<8x32xbf16>, vector<32x128xbf16>, vector<8x128xf32> -> vector<8x128xf32>
    %c0_52 = arith.constant 0 : index
    %c0_53 = arith.constant 0 : index
    %145 = vector.load %arg12[%c0_52, %c0_53] : memref<1x128xf32, #tpu.memory_space<vmem>>, vector<1x128xf32>
    %146 = vector.broadcast %145 : vector<1x128xf32> to vector<8x128xf32>
    %147 = arith.addf %144, %146 : vector<8x128xf32>
    %cst_54 = arith.constant 0.000000e+00 : f32
    %148 = vector.broadcast %cst_54 : f32 to vector<8x128xf32>
    %149 = arith.maximumf %147, %148 : vector<8x128xf32>
    %150 = arith.truncf %149 : vector<8x128xf32> to vector<8x128xbf16>
    %c0_55 = arith.constant 0 : index
    %c0_56 = arith.constant 0 : index
    %151 = vector.load %arg13[%c0_55, %c0_56] : memref<128x32xbf16, #tpu.memory_space<vmem>>, vector<128x32xbf16>
    %cst_57 = arith.constant dense<0.000000e+00> : vector<8x32xf32>
    %152 = tpu.matmul %150, %151, %cst_57 {dimension_numbers = #tpu.dot_dimension_numbers<[1], [0], [0], [1], [0, 0, 1, 1], [], []>} : vector<8x128xbf16>, vector<128x32xbf16>, vector<8x32xf32> -> vector<8x32xf32>
    %c0_58 = arith.constant 0 : index
    %c0_59 = arith.constant 0 : index
    %153 = vector.load %arg14[%c0_58, %c0_59] : memref<1x32xf32, #tpu.memory_space<vmem>>, vector<1x32xf32>
    %154 = vector.broadcast %153 : vector<1x32xf32> to vector<8x32xf32>
    %155 = arith.addf %152, %154 : vector<8x32xf32>
    %156 = arith.addf %117, %155 : vector<8x32xf32>
    %c0_60 = arith.constant 0 : index
    %c0_61 = arith.constant 0 : index
    %c0_62 = arith.constant 0 : index
    %157 = vector.load %arg15[%c0_60, %c0_61, %c0_62] : memref<1x8x32xf32, #tpu.memory_space<vmem>>, vector<1x8x32xf32>
    %158 = vector.shape_cast %157 : vector<1x8x32xf32> to vector<8x32xf32>
    %159 = vector.shape_cast %156 : vector<8x32xf32> to vector<1x8x32xf32>
    tpu.vector_store %arg15[%c0_60, %c0_61, %c0_62], %159 {strides = array<i32>} : memref<1x8x32xf32, #tpu.memory_space<vmem>>, vector<1x8x32xf32>,
    return
  }
  func.func @transform_0(%arg0: i32) -> (i32, i32, i32) {
    %c0_i32 = arith.constant 0 : i32
    %c0_i32_0 = arith.constant 0 : i32
    %c0_i32_1 = arith.constant 0 : i32
    return %arg0, %c0_i32, %c0_i32_0 : i32, i32, i32
  }
  func.func @transform_1(%arg0: i32) -> (i32, i32, i32, i32) {
    %c0_i32 = arith.constant 0 : i32
    %c0_i32_0 = arith.constant 0 : i32
    %c0_i32_1 = arith.constant 0 : i32
    %c0_i32_2 = arith.constant 0 : i32
    return %arg0, %c0_i32, %c0_i32_0, %c0_i32_1 : i32, i32, i32, i32
  }
  func.func @transform_2(%arg0: i32) -> (i32, i32) {
    %c0_i32 = arith.constant 0 : i32
    %c0_i32_0 = arith.constant 0 : i32
    %c0_i32_1 = arith.constant 0 : i32
    return %c0_i32, %c0_i32_0 : i32, i32
  }
  func.func @transform_3(%arg0: i32) -> (i32, i32) {
    %c0_i32 = arith.constant 0 : i32
    %c0_i32_0 = arith.constant 0 : i32
    %c0_i32_1 = arith.constant 0 : i32
    return %c0_i32, %c0_i32_0 : i32, i32
  }
  func.func @transform_4(%arg0: i32) -> (i32, i32) {
    %c0_i32 = arith.constant 0 : i32
    %c0_i32_0 = arith.constant 0 : i32
    %c0_i32_1 = arith.constant 0 : i32
    return %c0_i32, %c0_i32_0 : i32, i32
  }
  func.func @transform_5(%arg0: i32) -> (i32, i32) {
    %c0_i32 = arith.constant 0 : i32
    %c0_i32_0 = arith.constant 0 : i32
    %c0_i32_1 = arith.constant 0 : i32
    return %c0_i32, %c0_i32_0 : i32, i32
  }
  func.func @transform_6(%arg0: i32) -> (i32, i32) {
    %c0_i32 = arith.constant 0 : i32
    %c0_i32_0 = arith.constant 0 : i32
    %c0_i32_1 = arith.constant 0 : i32
    return %c0_i32, %c0_i32_0 : i32, i32
  }
  func.func @transform_7(%arg0: i32) -> (i32, i32) {
    %c0_i32 = arith.constant 0 : i32
    %c0_i32_0 = arith.constant 0 : i32
    %c0_i32_1 = arith.constant 0 : i32
    return %c0_i32, %c0_i32_0 : i32, i32
  }
  func.func @transform_8(%arg0: i32) -> (i32, i32) {
    %c0_i32 = arith.constant 0 : i32
    %c0_i32_0 = arith.constant 0 : i32
    %c0_i32_1 = arith.constant 0 : i32
    return %c0_i32, %c0_i32_0 : i32, i32
  }
  func.func @transform_9(%arg0: i32) -> (i32, i32) {
    %c0_i32 = arith.constant 0 : i32
    %c0_i32_0 = arith.constant 0 : i32
    %c0_i32_1 = arith.constant 0 : i32
    return %c0_i32, %c0_i32_0 : i32, i32
  }
  func.func @transform_10(%arg0: i32) -> (i32, i32) {
    %c0_i32 = arith.constant 0 : i32
    %c0_i32_0 = arith.constant 0 : i32
    %c0_i32_1 = arith.constant 0 : i32
    return %c0_i32, %c0_i32_0 : i32, i32
  }
  func.func @transform_11(%arg0: i32) -> (i32, i32) {
    %c0_i32 = arith.constant 0 : i32
    %c0_i32_0 = arith.constant 0 : i32
    %c0_i32_1 = arith.constant 0 : i32
    return %c0_i32, %c0_i32_0 : i32, i32
  }
  func.func @transform_12(%arg0: i32) -> (i32, i32) {
    %c0_i32 = arith.constant 0 : i32
    %c0_i32_0 = arith.constant 0 : i32
    %c0_i32_1 = arith.constant 0 : i32
    return %c0_i32, %c0_i32_0 : i32, i32
  }
  func.func @transform_13(%arg0: i32) -> (i32, i32) {
    %c0_i32 = arith.constant 0 : i32
    %c0_i32_0 = arith.constant 0 : i32
    %c0_i32_1 = arith.constant 0 : i32
    return %c0_i32, %c0_i32_0 : i32, i32
  }
  func.func @transform_14(%arg0: i32) -> (i32, i32, i32) {
    %c0_i32 = arith.constant 0 : i32
    %c0_i32_0 = arith.constant 0 : i32
    %c0_i32_1 = arith.constant 0 : i32
    return %arg0, %c0_i32, %c0_i32_0 : i32, i32, i32
  }
}

</mosaic_0001>

<bundles_post_ra>
// kernel: tpu_custom_call.1
= control target key start
LH: loop header
LB: loop body
LE: loop exit
PB: predicated region body
PF: predicated region fallthrough
CT: control target
= control target key end

     0   :  { %s2098_s0 = inlined_call_operand.vmem [shape: f32[2,8,32], index: 0, kind: input, shape index: {}]   ;;  %s2099_s1 = inlined_call_operand.vmem [shape: f32[2,1,8,8], index: 1, kind: input, shape index: {}]   ;;  %s2100_s2 = inlined_call_operand.vmem [shape: bf16[32,96], index: 2, kind: input, shape index: {}]   ;;  %s2101_s3 = inlined_call_operand.vmem [shape: f32[1,96], index: 3, kind: input, shape index: {}]   ;;  %s2102_s4 = inlined_call_operand.vmem [shape: bf16[32,32], index: 4, kind: input, shape index: {}]   ;;  %s2103_s5 = inlined_call_operand.vmem [shape: f32[1,32], index: 5, kind: input, shape index: {}]   ;;  %s2104_s6 = inlined_call_operand.vmem [shape: f32[1,32], index: 6, kind: input, shape index: {}]   ;;  %s2105_s7 = inlined_call_operand.vmem [shape: f32[1,32], index: 7, kind: input, shape index: {}]   ;;  %s2106_s8 = inlined_call_operand.vmem [shape: f32[1,32], index: 8, kind: input, shape index: {}]   ;;  %s2107_s9 = inlined_call_operand.vmem [shape: f32[1,32], index: 9, kind: input, shape index: {}]   ;;  %s2108_s10 = inlined_call_operand.vmem [shape: bf16[32,128], index: 10, kind: input, shape index: {}]   ;;  %s2109_s11 = inlined_call_operand.vmem [shape: f32[1,128], index: 11, kind: input, shape index: {}]   ;;  %s2110_s12 = inlined_call_operand.vmem [shape: bf16[128,32], index: 12, kind: input, shape index: {}]   ;;  %s2111_s13 = inlined_call_operand.vmem [shape: f32[1,32], index: 13, kind: input, shape index: {}]   ;;  %s2112_s14 = inlined_call_operand.hbm [shape: f32[2,8,32], index: 14, kind: output, shape index: {}]  }
   0x1   :  { %2114 = sst [smem:[#allocation5_spill]] %s2098_s0 }
   0x2   :  { %2115 = sst [smem:[#allocation6_spill]] %s2099_s1 }
   0x3   :  { %2116 = sst [smem:[#allocation7_spill]] %s2100_s2 }
   0x4   :  { %2117 = sst [smem:[#allocation8_spill]] %s2101_s3 }
   0x5   :  { %19 = vsyncpa [#allocation3], 0 }
   0x6   :  { %21 = vsyncpa [#allocation3 + $0x1], 0  ;;  %s1819_s29 = smov 0   ;;  %s1821_s30 = smov 0  }
   0x7   :  { %s1823_s15 = smov 0   ;;  %s1825_s16 = smov 0  }
   0x8 LB: > { %s1840_s17 = sadd.s32 4294967295, %s1725_s16   ;;  %s1404_s18 = sadd.s32 4294967294, %s1725_s16   ;;  %s1725_s16 = sphi %s1825_s16, %s2128_s16   ;;  %s1721_s15 = sphi %s1823_s15, %s2127_s15   ;;  %s1717_s30 = sphi %s1821_s30, %s2126_s30   ;;  %s1713_s29 = sphi %s1819_s29, %s2125_s29  }
   0x9   : > { %s1844_s19 = sadd.s32 1, %s1725_s16   ;;  %s338_s20 = sadd.s32 1, %s1721_s15 }
   0xa   : > { %s335_s21 = ssub.s32 %s1725_s16, %s1844_s19  ;;  %p348_p0 = scmp.ne.s32.totalorder %s1721_s15, %s1717_s30 }
   0xb   : > { %p336_p1 = scmp.eq.s32.totalorder %s335_s21, 0  ;;  %p349_p2 = scmp.eq.s32.totalorder %s1840_s17, 1 }
   0xc   : > { %p354_p3 = scmp.ne.s32.totalorder %s1717_s30, %s1713_s29  ;;  %p355_p4 = scmp.eq.s32.totalorder %s1404_s18, 1 }
   0xd   : > { %s1855_s22 = scalar_select %p336_p1, %s1721_s15, %s338_s20  }
   0xe   : > { %p1857_p5 = por %p349_p2, %p348_p0  ;;  %p1861_p6 = por %p355_p4, %p354_p3 }
   0xf   : > { %p1407_p7 = scmp.ge.s32.totalorder %s1725_s16, 1  ;;  %p423_p8 = scmp.lt.s32.totalorder %s1725_s16, 3 }
  0x11   : > { %p424_p9 = pnand %p1407_p7, %p423_p8 }
  0x12   : > { %p472_p10 = scmp.lt.s32.totalorder (!%p424_p9), %s1840_s17, 1  ;;  %vm485_vm0 = vcmask (!%p424_p9), 261120   ;;  %s2120_s0 = sld [smem:[#allocation5_spill]] (!%p424_p9)  ;;  %v1727_v8 = vmov (!%p424_p9), 0.0   ;;  %vm1728_vm1 = vmmov (!%p424_p9), 0   ;;  %vm585_vm2 = vcmask (!%p424_p9), 64512  }
  0x13   : > { %427 = sbr.rel (%p424_p9) target bundleno = 2585 (0xa19), region = 76  ;;  %s2121_s2 = sld [smem:[#allocation7_spill]] (!%p424_p9)  ;;  %1482 = vmatprep.subr.bf16.mxu0 (!%p424_p9), %v1727_v8  ;;  %1486 = vmatprep.mubr.msk.bf16.mxu0 (!%p424_p9), %vm1728_vm1, %v1727_v8  ;;  %v1411_v14 = vld [vmem:[%s2104_s6] ss:$0 sm:$0xff] (!%p424_p9)  ;;  %vm649_vm3 = vcmask (!%p424_p9), 1043456   ;;  %vm1036_vm4 = vcmask (!%p424_p9), 130048  }
  0x14   : > { %1502 = vmatprep.subr.bf16.mxu1 (!%p424_p9), %v1727_v8  ;;  %1504 = vmatprep.mubr.msk.bf16.mxu1 (!%p424_p9), %vm1728_vm1, %v1727_v8  ;;  %v1412_v16 = vld [vmem:[%s2105_s7] ss:$0 sm:$0xff] (!%p424_p9)  ;;  %s2122_s3 = sld [smem:[#allocation8_spill]] (!%p424_p9)  ;;  %s1730_s20 = smov (!%p424_p9), 96   ;;  %vm1038_vm5 = vcmask (!%p424_p9), 195584  }
  0x15   : > { %s1731_s21 = smov (!%p424_p9), 88   ;;  %s1732_s27 = smov (!%p424_p9), 80  }
  0x16   : > { %s1734_s28 = smov (!%p424_p9), 72   ;;  %s2124_s1 = sld [smem:[#allocation6_spill]] (!%p424_p9) }
  0x19   : > { %v1629_v7 = vld [vmem:[%s2121_s2] sm:$0xff] (!%p424_p9)   ;;  %v1630_v9 = vld [vmem:[%s2121_s2 + $0x8] sm:$0xff] (!%p424_p9)  }
  0x1a   : > { %s1869_s25 = scalar_select %p472_p10, %s1840_s17, 1  ;;  %1483 = vmatpush3.bf16.msra.mxu0 %v1629_v7  ;;  %v1413_v20 = vld [vmem:[%s2122_s3] ss:$0 sm:$0xff] }
  0x1b   : > { %1484 = vmatprep.subr.bf16.mxu0 %v1727_v8 }
  0x1c   : > { %s2113_s26 = sshll.u32 %s1869_s25, 3 }
  0x1d   : > { %s475_s18 = scalar_lea.vmem %s2120_s0, %s2113_s26  ;;  %s1733_s26 = smov 112  }
  0x1e   : > { %v1877_v0 = vld [vmem:[%s475_s18] sm:$0xff]  ;;  %1485 = vmatpush3.bf16.msra.mxu0 %v1630_v9  ;;  %s1729_s18 = smov 120   ;;  %s1735_s0 = smov 104  }
  0x1f   : > { %v486_v1 = vsel %vm485_vm0, %v1877_v0, 0.0  ;;  %1490 = vmatprep.subr.bf16.mxu0 %v1727_v8 }
  0x20   : > { %487 = vadd.xlane.f32.xlu0 %v486_v1 }
  0xad   : > { %v488_v2 = vpop.xlane.xlu0 %487 }
  0xae   : > { %v490_v3 = vmul.f32 0.03125, %v488_v2 }
  0xb0   : > { %v491_v4 = vsub.f32 %v1877_v0, %v490_v3 }
  0xb2   : > { %v492_v5 = vmul.f32 %v491_v4, %v491_v4 }
  0xb4   : > { %v493_v6 = vsel %vm485_vm0, %v492_v5, 0.0 }
  0xb5   : > { %494 = vadd.xlane.f32.xlu0 %v493_v6 }
 0x142   : > { %v495_v10 = vpop.xlane.xlu0 %494 }
 0x143   : > { %v496_v11 = vmul.f32 0.03125, %v495_v10 }
 0x145   : > { %v497_v12 = vadd.f32 1e-05, %v496_v11 }
 0x147   : > { %1643 = vrsqrt.f32 %v497_v12 }
 0x151   : > { %v1644_v13 = vpop.eup %1643 }
 0x152   : > { %v499_v15 = vmul.f32 %v1644_v13, %v491_v4 }
 0x154   : > { %v506_v17 = vmul.f32 %v1411_v14, %v499_v15 }
 0x156   : > { %v513_v18 = vadd.f32 %v1412_v16, %v506_v17 }
 0x158   : > { %v514_v19 = vpack.c.bf16 %v513_v18, %v513_v18 }
 0x15a   : > { %1487 = vmatmul.mubr.msk.bf16.vlgmr.msra.gmra.mrb[0].mxu0 %vm485_vm0, %v514_v19 }
 0x15b   : > { %1492 = vmatprep.mubr.msk.bf16.mxu0 %vm1728_vm1, %v1727_v8 }
 0x22d   : > { %v575_v21 = vpop.f32.mrb[0].mxu0 }
 0x22e   : > { %v576_v22 = vadd.f32 %v1413_v20, %v575_v21  ;;  %v1488_v23 = vpop.f32.mrb[1].mxu0 }
 0x22f   : > { %v578_v24 = vpop.f32.mrb[2].mxu0 }
 0x230   : > { %v1909_v25 = vpack.c.bf16 %v576_v22, %v576_v22  ;;  %v1489_v26 = vpop.f32.mrb[3].mxu0 }
 0x232   : > { %693 = vrot.lane.b32.xlu0 %v1909_v25, %s1729_s18  ;;  %583 = vrot.lane.b32.xlu1 %v1909_v25, %s1730_s20 }
 0x236   : > { %695 = vrot.lane.b32.xlu1 %v1909_v25, %s1731_s21 }
 0x23a   : > { %805 = vrot.lane.b32.xlu1 %v1909_v25, %s1732_s27  ;;  %s1737_s27 = smov 56  }
 0x23e   : > { %803 = vrot.lane.b32.xlu1 %v1909_v25, %s1733_s26  ;;  %s1738_s26 = smov 48  }
 0x242   : > { %915 = vrot.lane.b32.xlu1 %v1909_v25, %s1734_s28  ;;  %s1739_s28 = smov 40  }
 0x246   : > { %913 = vrot.lane.b32.xlu1 %v1909_v25, %s1735_s0  ;;  %s2123_s0 = sshll.u32 %s1869_s25, 3  ;;  %s1736_s25 = smov 64  }
 0x247   : > { %s479_s21 = scalar_lea.vmem %s2124_s1, %s2123_s0  ;;  %s1740_s0 = smov 8  }
 0x248   : > { %v482_v38 = vld [vmem:[%s479_s21] sm:$0xff]  ;;  %s469_s21 = sand.u32 1, %s1717_s30  }
 0x2a4   : > { %v584_v27 = vpop.permute.xlu1 %583  ;;  %v694_v32 = vpop.permute.xlu0 %693 }
 0x2a5   : > { %v590_v28 = vsel %vm585_vm2, %v584_v27, 0 }
 0x2a6   : > { %1491 = vmatpush3.bf16.xpose.msra.mxu0 %v590_v28 }
 0x2a7   : > { %1496 = vmatprep.subr.bf16.mxu0 %v1727_v8 }
 0x2a8   : > { %v696_v29 = vpop.permute.xlu1 %695 }
 0x2a9   : > { %v701_v30 = vsel %vm585_vm2, %v696_v29, 0 }
 0x2aa   : > { %1503 = vmatpush3.bf16.xpose.msra.mxu1 %v701_v30 }
 0x2ab   : > { %1514 = vmatprep.subr.bf16.mxu1 %v1727_v8 }
 0x2ac   : > { %v806_v31 = vpop.permute.xlu1 %805 }
 0x2ad   : > { %1493 = vmatmul.mubr.msk.bf16.vlgmr.msra.gmra.mrb[4].mxu0 %vm585_vm2, %v1909_v25  ;;  %v811_v34 = vsel %vm585_vm2, %v806_v31, 0 }
 0x2ae   : > { %1498 = vmatprep.mubr.msk.bf16.mxu0 %vm1728_vm1, %v1727_v8 }
 0x2b0   : > { %v804_v33 = vpop.permute.xlu1 %803 }
 0x2b1   : > { %1505 = vmatmul.mubr.msk.bf16.vlgmr.msra.gmra.mrb[0].mxu1 %vm585_vm2, %v694_v32 }
 0x2b2   : > { %1515 = vmatpush3.bf16.xpose.msra.mxu1 %v811_v34  ;;  %1516 = vmatprep.mubr.msk.bf16.mxu1 %vm1728_vm1, %v1727_v8 }
 0x2b3   : > { %1526 = vmatprep.subr.bf16.mxu1 %v1727_v8 }
 0x2b4   : > { %v916_v35 = vpop.permute.xlu1 %915 }
 0x2b5   : > { %v921_v36 = vsel %vm585_vm2, %v916_v35, 0 }
 0x2b8   : > { %v914_v37 = vpop.permute.xlu1 %913 }
 0x2b9   : > { %1517 = vmatmul.mubr.msk.bf16.vlgmr.msra.gmra.mrb[4].mxu1 %vm585_vm2, %v804_v33 }
 0x2ba   : > { %1527 = vmatpush3.bf16.xpose.msra.mxu1 %v921_v36  ;;  %1528 = vmatprep.mubr.msk.bf16.mxu1 %vm1728_vm1, %v1727_v8 }
 0x2bb   : > { %1538 = vmatprep.subr.bf16.mxu1 %v1727_v8 }
 0x2c1   : > { %1529 = vmatmul.mubr.msk.bf16.vlgmr.msra.gmra.mrb[8].mxu1 %vm585_vm2, %v914_v37 }
 0x2c2   : > { %1542 = vmatprep.mubr.msk.bf16.mxu1 %vm1728_vm1, %v1727_v8 }
 0x380   : > { %v626_v39 = vpop.f32.mrb[4].mxu0 }
 0x381   : > { %v627_v40 = vadd.f32 %v626_v39, %v482_v38  ;;  %v1494_v41 = vpop.f32.mrb[5].mxu0 }
 0x382   : > { %v629_v42 = vpop.f32.mrb[6].mxu0 }
 0x383   : > { %v1495_v43 = vpop.f32.mrb[7].mxu0  ;;  %v632_v44 = vsel %vm585_vm2, %v627_v40, -inf }
 0x384   : > { %v737_v45 = vpop.f32.mrb[0].mxu1  ;;  %633 = vmax.xlane.f32.xlu1 %v632_v44 }
 0x385   : > { %v738_v46 = vadd.f32 %v737_v45, %v482_v38  ;;  %v1506_v47 = vpop.f32.mrb[1].mxu1 }
 0x386   : > { %v740_v48 = vpop.f32.mrb[2].mxu1 }
 0x387   : > { %v1507_v49 = vpop.f32.mrb[3].mxu1  ;;  %v743_v50 = vsel %vm585_vm2, %v738_v46, -inf }
 0x388   : > { %744 = vmax.xlane.f32.xlu0 %v743_v50 }
 0x38c   : > { %v847_v51 = vpop.f32.mrb[4].mxu1 }
 0x38d   : > { %v848_v52 = vadd.f32 %v847_v51, %v482_v38  ;;  %v1518_v53 = vpop.f32.mrb[5].mxu1 }
 0x38e   : > { %v850_v54 = vpop.f32.mrb[6].mxu1  ;;  %v1631_v53 = vld [vmem:[%s2102_s4] sm:$0xff]  }
 0x38f   : > { %v1519_v55 = vpop.f32.mrb[7].mxu1  ;;  %v853_v56 = vsel %vm585_vm2, %v848_v52, -inf  ;;  %1539 = vmatpush3.bf16.msra.mxu1 %v1631_v53  ;;  %v1632_v54 = vld [vmem:[%s2102_s4 + $0x8] sm:$0xff]  }
 0x390   : > { %854 = vmax.xlane.f32.xlu1 %v853_v56  ;;  %1540 = vmatprep.subr.bf16.mxu1 %v1727_v8 }
 0x393   : > { %1541 = vmatpush3.bf16.msra.mxu1 %v1632_v54 }
 0x394   : > { %v957_v57 = vpop.f32.mrb[8].mxu1  ;;  %1554 = vmatprep.subr.bf16.mxu1 %v1727_v8 }
 0x395   : > { %v958_v58 = vadd.f32 %v957_v57, %v482_v38  ;;  %v1530_v59 = vpop.f32.mrb[9].mxu1 }
 0x396   : > { %v960_v60 = vpop.f32.mrb[10].mxu1 }
 0x397   : > { %v1531_v61 = vpop.f32.mrb[11].mxu1  ;;  %v963_v62 = vsel %vm585_vm2, %v958_v58, -inf }
 0x398   : > { %964 = vmax.xlane.f32.xlu0 %v963_v62 }
 0x411   : > { %v634_v63 = vpop.xlane.xlu1 %633 }
 0x412   : > { %v635_v1 = vsub.f32 %v627_v40, %v634_v63 }
 0x414   : > { %v636_v2 = vmul.f32 1.442695, %v635_v1 }
 0x415   : > { %v745_v3 = vpop.xlane.xlu0 %744 }
 0x416   : > { %1645 = vpow2.f32 %v636_v2  ;;  %v746_v4 = vsub.f32 %v738_v46, %v745_v3 }
 0x418   : > { %v747_v5 = vmul.f32 1.442695, %v746_v4 }
 0x41a   : > { %1647 = vpow2.f32 %v747_v5 }
 0x41d   : > { %v855_v16 = vpop.xlane.xlu1 %854 }
 0x41e   : > { %v856_v17 = vsub.f32 %v848_v52, %v855_v16 }
 0x420   : > { %v1646_v6 = vpop.eup %1645  ;;  %v857_v18 = vmul.f32 1.442695, %v856_v17 }
 0x421   : > { %v638_v7 = vsel %vm585_vm2, %v1646_v6, 0.0 }
 0x422   : > { %639 = vadd.xlane.f32.xlu1 %v638_v7  ;;  %v1425_v7 = vld [vmem:[%s2103_s5] ss:$0 sm:$0xff] }
 0x424   : > { %v1648_v9 = vpop.eup %1647 }
 0x425   : > { %v965_v10 = vpop.xlane.xlu0 %964  ;;  %v749_v11 = vsel %vm585_vm2, %v1648_v9, 0.0 }
 0x426   : > { %v966_v12 = vsub.f32 %v958_v58, %v965_v10  ;;  %750 = vadd.xlane.f32.xlu0 %v749_v11 }
 0x428   : > { %v967_v13 = vmul.f32 1.442695, %v966_v12 }
 0x42a   : > { %1649 = vpow2.f32 %v967_v13 }
 0x42b   : > { %1651 = vpow2.f32 %v857_v18 }
 0x433   : > { %644 = vrot.lane.b32.xlu1 %v1909_v25, %s1736_s25  ;;  %s1408_s25 = sshll.u32 %s469_s21, 3 }
 0x434   : > { %v1650_v14 = vpop.eup %1649 }
 0x435   : > { %v969_v15 = vsel %vm585_vm2, %v1650_v14, 0.0  ;;  %v1652_v19 = vpop.eup %1651 }
 0x436   : > { %970 = vadd.xlane.f32.xlu0 %v969_v15  ;;  %v859_v20 = vsel %vm585_vm2, %v1652_v19, 0.0 }
 0x44c   : > { %755 = vrot.lane.b32.xlu0 %v1909_v25, %s1737_s27  ;;  %s1741_s27 = smov 16  }
 0x457   : > { %860 = vadd.xlane.f32.xlu1 %v859_v20 }
 0x468   : > { %865 = vrot.lane.b32.xlu1 %v1909_v25, %s1738_s26  ;;  %s1742_s26 = smov 24  }
 0x46c   : > { %975 = vrot.lane.b32.xlu1 %v1909_v25, %s1739_s28  ;;  %s1445_s28 = sshll.u32 %s1840_s17, 7  ;;  %s1320_s17 = scalar_lea.sflag [#allocation3], %s469_s21 }
 0x46d   : > { %s2055_s2 = scalar_lea.hbm %s2112_s14, %s1445_s28 }
 0x4af   : > { %v640_v21 = vpop.xlane.xlu1 %639 }
 0x4b0   : > { %1653 = vrcp.f32 %v640_v21  ;;  %v1633_v21 = vld [vmem:[%s2108_s10] sm:$0xff]  }
 0x4b3   : > { %v645_v22 = vpop.permute.xlu1 %644  ;;  %v751_v24 = vpop.xlane.xlu0 %750 }
 0x4b4   : > { %v651_v23 = vsel %vm649_vm3, %v645_v22, 0  ;;  %1655 = vrcp.f32 %v751_v24  ;;  %v1635_v22 = vld [vmem:[%s2110_s12] sm:$0xff]   ;;  %v1637_v24 = vld [vmem:[%s2110_s12 + $0x10] sm:$0xff]  }
 0x4b5   : > { %1497 = vmatpush3.bf16.msra.mxu0 %v651_v23  ;;  %v1636_v23 = vld [vmem:[%s2110_s12 + $0x8] sm:$0xff]  }
 0x4b6   : > { %1508 = vmatprep.subr.bf16.mxu0 %v1727_v8 }
 0x4ba   : > { %v1654_v26 = vpop.eup %1653 }
 0x4bb   : > { %v642_v27 = vmul.f32 %v1654_v26, %v1646_v6  ;;  %v1638_v26 = vld [vmem:[%s2110_s12 + $0x18] sm:$0xff]  }
 0x4bd   : > { %v643_v28 = vpack.c.bf16 %v642_v27, %v642_v27  ;;  %v1639_v27 = vld [vmem:[%s2110_s12 + $0x20] sm:$0xff]  }
 0x4be   : > { %v1656_v25 = vpop.eup %1655 }
 0x4bf   : > { %1499 = vmatmul.mubr.msk.bf16.vlgmr.msra.gmra.mrb[8].mxu0 %vm585_vm2, %v643_v28  ;;  %v753_v30 = vmul.f32 %v1656_v25, %v1648_v9  ;;  %v1640_v28 = vld [vmem:[%s2110_s12 + $0x28] sm:$0xff]  }
 0x4c0   : > { %1510 = vmatprep.mubr.msk.bf16.mxu0 %vm1728_vm1, %v1727_v8 }
 0x4c1   : > { %v754_v33 = vpack.c.bf16 %v753_v30, %v753_v30 }
 0x4c3   : > { %v971_v29 = vpop.xlane.xlu0 %970 }
 0x4c7   : > { %v756_v31 = vpop.permute.xlu0 %755 }
 0x4c8   : > { %v761_v32 = vsel %vm649_vm3, %v756_v31, 0 }
 0x4c9   : > { %1509 = vmatpush3.bf16.msra.mxu0 %v761_v32  ;;  %v1429_v32 = vld [vmem:[%s2106_s8] ss:$0 sm:$0xff] }
 0x4ca   : > { %1520 = vmatprep.subr.bf16.mxu0 %v1727_v8 }
 0x4cc   : > { %1511 = vmatmul.mubr.msk.bf16.vlgmr.msra.gmra.mrb[12].mxu0 %vm585_vm2, %v754_v33 }
 0x4cd   : > { %1522 = vmatprep.mubr.msk.bf16.mxu0 %vm1728_vm1, %v1727_v8 }
 0x4e4   : > { %v861_v34 = vpop.xlane.xlu1 %860 }
 0x4e5   : > { %1657 = vrcp.f32 %v861_v34  ;;  %v1430_v34 = vld [vmem:[%s2107_s9] ss:$0 sm:$0xff] }
 0x4e6   : > { %1659 = vrcp.f32 %v971_v29 }
 0x4e8   : > { %v866_v35 = vpop.permute.xlu1 %865 }
 0x4e9   : > { %v871_v36 = vsel %vm649_vm3, %v866_v35, 0 }
 0x4ea   : > { %1521 = vmatpush3.bf16.msra.mxu0 %v871_v36 }
 0x4eb   : > { %1532 = vmatprep.subr.bf16.mxu0 %v1727_v8 }
 0x4ec   : > { %v976_v39 = vpop.permute.xlu1 %975 }
 0x4ed   : > { %v981_v42 = vsel %vm649_vm3, %v976_v39, 0  ;;  %v1642_v39 = vld [vmem:[%s2110_s12 + $0x38] sm:$0xff]  }
 0x4ef   : > { %v1658_v37 = vpop.eup %1657 }
 0x4f0   : > { %v863_v38 = vmul.f32 %v1658_v37, %v1652_v19  ;;  %v1660_v41 = vpop.eup %1659 }
 0x4f1   : > { %v973_v43 = vmul.f32 %v1660_v41, %v1650_v14 }
 0x4f2   : > { %v864_v40 = vpack.c.bf16 %v863_v38, %v863_v38  ;;  %v1641_v38 = vld [vmem:[%s2110_s12 + $0x30] sm:$0xff]  }
 0x4f3   : > { %v974_v44 = vpack.c.bf16 %v973_v43, %v973_v43 }
 0x4f4   : > { %1523 = vmatmul.mubr.msk.bf16.vlgmr.msra.gmra.mrb[16].mxu0 %vm585_vm2, %v864_v40  ;;  %v1431_v40 = vld [vmem:[%s2109_s11] ss:$0 sm:$0xff] }
 0x4f5   : > { %1533 = vmatpush3.bf16.msra.mxu0 %v981_v42  ;;  %1534 = vmatprep.mubr.msk.bf16.mxu0 %vm1728_vm1, %v1727_v8 }
 0x4f6   : > { %1546 = vmatprep.subr.bf16.mxu0 %v1727_v8 }
 0x4fc   : > { %1535 = vmatmul.mubr.msk.bf16.vlgmr.msra.gmra.mrb[20].mxu0 %vm585_vm2, %v974_v44 }
 0x4fd   : > { %1550 = vmatprep.mubr.msk.bf16.mxu0 %vm1728_vm1, %v1727_v8  ;;  %1547 = vmatpush3.bf16.msra.mxu0 %v1633_v21 }
 0x4fe   : > { %1548 = vmatprep.subr.bf16.mxu0 %v1727_v8 }
 0x592   : > { %v687_v45 = vpop.f32.mrb[8].mxu0 }
 0x593   : > { %v1500_v46 = vpop.f32.mrb[9].mxu0 }
 0x594   : > { %v690_v47 = vpop.f32.mrb[10].mxu0 }
 0x595   : > { %v1501_v48 = vpop.f32.mrb[11].mxu0 }
 0x59f   : > { %v797_v49 = vpop.f32.mrb[12].mxu0 }
 0x5a0   : > { %1024 = vrot.lane.b32.xlu0 %v797_v49, %s1740_s0  ;;  %v1512_v50 = vpop.f32.mrb[13].mxu0  ;;  %s471_s0 = scalar_lea.vmem [#allocation2], %s1408_s25 }
 0x5a1   : > { %v800_v51 = vpop.f32.mrb[14].mxu0  ;;  %s1333_s18 = sshll.u32 %s471_s0, 4  ;;  %s2057_s18 = int_to_ptr.vmem [resolvable:$true] %s1333_s18 }
 0x5a2   : > { %v1513_v52 = vpop.f32.mrb[15].mxu0  ;;  %s1663_s25 = scalar_lea.vmem %s2057_s18, 128 }
 0x5a3   : > { %p1664_p11 = scmp.ne.s32.totalorder %s2057_s18, %s1663_s25 }
 0x5a5   : > { %p1665_p12 = pnand %p1664_p11, %p1857_p5 }
 0x5a7   : > { %p1666_p13 = pneg %p1665_p12 }
 0x5c7   : > { %v907_v55 = vpop.f32.mrb[16].mxu0 }
 0x5c8   : > { %1028 = vrot.lane.b32.xlu1 %v907_v55, %s1741_s27  ;;  %v1524_v56 = vpop.f32.mrb[17].mxu0  ;;  %s1743_s27 = smov [#allocation2]  }
 0x5c9   : > { %v910_v57 = vpop.f32.mrb[18].mxu0 }
 0x5ca   : > { %v1525_v58 = vpop.f32.mrb[19].mxu0 }
 0x5cf   : > { %v1017_v59 = vpop.f32.mrb[20].mxu0 }
 0x5d0   : > { %1032 = vrot.lane.b32.xlu0 %v1017_v59, %s1742_s26  ;;  %v1536_v60 = vpop.f32.mrb[21].mxu0  ;;  %s1667_s26 = sshll.u32 %s1743_s27, 4  ;;  %s1668_s26 = int_to_ptr.vmem [resolvable:$false] %s1667_s26 }
 0x5d1   : > { %v1020_v61 = vpop.f32.mrb[22].mxu0  ;;  %s1669_s3 = scalar_lea.vmem %s1668_s26, 256  ;;  %p1670_p0 = scmp.lt.s32.totalorder %s2057_s18, %s1668_s26 }
 0x5d2   : > { %v1537_v62 = vpop.f32.mrb[23].mxu0  ;;  %p1671_p1 = scmp.lt.s32.totalorder %s1669_s3, %s1663_s25 }
 0x5d4   : > { %p1672_p2 = por %p1671_p1, %p1670_p0 }
 0x5d6   : > { %p1673_p3 = pnand %p1672_p2, %p1666_p13 }
 0x612   : > { %v1025_v63 = vpop.permute.xlu0 %1024 }
 0x613   : > { %v1035_v2 = vsel %vm585_vm2, %v687_v45, %v1025_v63 }
 0x63a   : > { %v1029_v1 = vpop.permute.xlu1 %1028 }
 0x63b   : > { %v1037_v3 = vsel %vm1036_vm4, %v1035_v2, %v1029_v1 }
 0x642   : > { %v1033_v4 = vpop.permute.xlu0 %1032 }
 0x643   : > { %v1039_v5 = vsel %vm1038_vm5, %v1037_v3, %v1033_v4 }
 0x644   : > { %v1040_v6 = vpack.c.bf16 %v1039_v5, %v1039_v5 }
 0x646   : > { %1543 = vmatmul.mubr.msk.bf16.vlgmr.msra.gmra.mrb[12].mxu1 %vm485_vm0, %v1040_v6 }
 0x647   : > { %1570 = vmatprep.mubr.msk.bf16.mxu1 %vm1728_vm1, %v1727_v8  ;;  %1555 = vmatpush3.bf16.msra.mxu1 %v1635_v22 }
 0x648   : > { %1556 = vmatprep.subr.bf16.mxu1 %v1727_v8 }
 0x64b   : > { %1557 = vmatpush3.bf16.msra.mxu1 %v1636_v23 }
 0x64c   : > { %1558 = vmatprep.subr.bf16.mxu1 %v1727_v8 }
 0x64f   : > { %1559 = vmatpush3.bf16.msra.mxu1 %v1637_v24 }
 0x650   : > { %1560 = vmatprep.subr.bf16.mxu1 %v1727_v8 }
 0x653   : > { %1561 = vmatpush3.bf16.msra.mxu1 %v1638_v26 }
 0x654   : > { %1562 = vmatprep.subr.bf16.mxu1 %v1727_v8 }
 0x657   : > { %1563 = vmatpush3.bf16.msra.mxu1 %v1639_v27 }
 0x658   : > { %1564 = vmatprep.subr.bf16.mxu1 %v1727_v8 }
 0x65b   : > { %1565 = vmatpush3.bf16.msra.mxu1 %v1640_v28 }
 0x65c   : > { %1566 = vmatprep.subr.bf16.mxu1 %v1727_v8 }
 0x65f   : > { %1567 = vmatpush3.bf16.msra.mxu1 %v1641_v38 }
 0x660   : > { %1568 = vmatprep.subr.bf16.mxu1 %v1727_v8  ;;  %v1435_v8 = vld [vmem:[%s2111_s13] ss:$0 sm:$0xff] }
 0x663   : > { %1569 = vmatpush3.bf16.msra.mxu1 %v1642_v39 }
 0x719   : > { %v1101_v9 = vpop.f32.mrb[12].mxu1 }
 0x71a   : > { %v1102_v10 = vadd.f32 %v1425_v7, %v1101_v9  ;;  %v1544_v11 = vpop.f32.mrb[13].mxu1 }
 0x71b   : > { %v1104_v12 = vpop.f32.mrb[14].mxu1 }
 0x71c   : > { %v1992_v13 = vadd.f32 %v1102_v10, %v1877_v0  ;;  %v1545_v14 = vpop.f32.mrb[15].mxu1  ;;  %v1634_v0 = vld [vmem:[%s2108_s10 + $0x8] sm:$0xff]  }
 0x71d   : > { %1549 = vmatpush3.bf16.msra.mxu0 %v1634_v0 }
 0x71e   : > { %v1110_v15 = vsel %vm485_vm0, %v1992_v13, 0.0 }
 0x71f   : > { %1111 = vadd.xlane.f32.xlu1 %v1110_v15 }
 0x7ac   : > { %v1112_v16 = vpop.xlane.xlu1 %1111 }
 0x7ad   : > { %v1113_v17 = vmul.f32 0.03125, %v1112_v16 }
 0x7af   : > { %v1114_v18 = vsub.f32 %v1992_v13, %v1113_v17 }
 0x7b1   : > { %v1115_v19 = vmul.f32 %v1114_v18, %v1114_v18 }
 0x7b3   : > { %v1116_v20 = vsel %vm485_vm0, %v1115_v19, 0.0 }
 0x7b4   : > { %1117 = vadd.xlane.f32.xlu0 %v1116_v20 }
 0x841   : > { %v1118_v25 = vpop.xlane.xlu0 %1117 }
 0x842   : > { %v1119_v29 = vmul.f32 0.03125, %v1118_v25 }
 0x844   : > { %v1120_v30 = vadd.f32 1e-05, %v1119_v29 }
 0x846   : > { %1661 = vrsqrt.f32 %v1120_v30 }
 0x850   : > { %v1662_v31 = vpop.eup %1661 }
 0x851   : > { %v1122_v33 = vmul.f32 %v1662_v31, %v1114_v18 }
 0x853   : > { %v1129_v35 = vmul.f32 %v1429_v32, %v1122_v33 }
 0x855   : > { %v1136_v36 = vadd.f32 %v1430_v34, %v1129_v35 }
 0x857   : > { %v1137_v37 = vpack.c.bf16 %v1136_v36, %v1136_v36 }
 0x859   : > { %1551 = vmatmul.mubr.msk.bf16.vlgmr.msra.gmra.mrb[24].mxu0 %vm485_vm0, %v1137_v37 }
 0x92c   : > { %v1198_v41 = vpop.f32.mrb[24].mxu0 }
 0x92d   : > { %v1199_v42 = vadd.f32 %v1431_v40, %v1198_v41  ;;  %v1552_v43 = vpop.f32.mrb[25].mxu0 }
 0x92e   : > { %v1201_v44 = vpop.f32.mrb[26].mxu0 }
 0x92f   : > { %v1204_v45 = vmax.f32 %v1199_v42, 0.0  ;;  %v1553_v46 = vpop.f32.mrb[27].mxu0 }
 0x931   : > { %v1205_v47 = vpack.c.bf16 %v1204_v45, %v1204_v45 }
 0x933   : > { %1571 = vmatmul.mubr.bf16.vlgmr.msra.gmra.mrb[16].mxu1 %v1205_v47 }
 0xa06   : > { %v1311_v48 = vpop.f32.mrb[16].mxu1 }
 0xa07   : > { %v1312_v49 = vadd.f32 %v1435_v8, %v1311_v48  ;;  %v1572_v50 = vpop.f32.mrb[17].mxu1 }
 0xa08   : > { %v1314_v51 = vpop.f32.mrb[18].mxu1 }
 0xa09   : > { %v1317_v52 = vadd.f32 %v1312_v49, %v1992_v13  ;;  %v1573_v53 = vpop.f32.mrb[19].mxu1 }
 0xa0b   : > { %1318 = vst.msk [vmem:[%s471_s0] sm:$0xff] %vm485_vm0, %v1317_v52 }
 0xa0c   : > { %1676 = shalt.err (!%p1673_p3)
}
 0xa0d   : > { %s1677_s1 = scalar_lea.hbm %s2055_s2, 128  ;;  %s1681_s0 = scalar_lea.hbm %s2112_s14, 256 }
 0xa0e   : > { %p1678_p4 = scmp.ne.s32.totalorder %s2055_s2, %s1677_s1  ;;  %p1682_p9 = scmp.lt.u32.totalorder %s2055_s2, %s2112_s14 }
 0xa0f   : > { %p1683_p10 = scmp.lt.u32.totalorder %s1681_s0, %s1677_s1  ;;  %p1685_p12 = scmp.lt.u32.totalorder %s1677_s1, %s2055_s2 }
 0xa10   : > { %p1679_p7 = pnand %p1678_p4, %p1857_p5 }
 0xa11   : > { %p1684_p11 = por %p1683_p10, %p1682_p9 }
 0xa12   : > { %p1680_p8 = pneg %p1679_p7 }
 0xa13   : > { %p1686_p13 = por %p1685_p12, %p1684_p11 }
 0xa15   : > { %p1687_p0 = pnand %p1686_p13, %p1680_p8 }
 0xa17   : > { %1690 = shalt.err (!%p1687_p0)
}
 0xa18   : > { %1574 = dma.vmem_to_hbm [thread:$0]  (%p1857_p5), %s2057_s18, 128, %s2055_s2, %s1320_s17  }
 0xa19 PF: > { %p1580_p1 = scmp.ge.s32.totalorder %s1725_s16, 2  ;;  %s1345_s3 = sand.u32 1, %s1713_s29  }
 0xa1a   : > { %s1346_s25 = scalar_lea.sflag [#allocation3], %s1345_s3 }
 0xa1b   : > { %p1577_p2 = pnand %p1580_p1, %p1861_p6 }
 0xa1d   : > { %1708 = dma.done.wait (!%p1577_p2), %s1346_s25, 128  }
 0xa1e   : > { %1710 = vsyncadd (!%p1577_p2), %s1346_s25, 4294967168  ;;  %p24_p3 = scmp.ge.s32.totalorder %s1844_s19, 4   ;;  %s2125_s29 = smov %s1717_s30 }
 0xa1f   : > { %s2126_s30 = smov %s1721_s15  ;;  %s2127_s15 = smov %s1855_s22 }
 0xa20   : > { %s2128_s16 = smov %s1844_s19  ;;  %26 = sbr.rel (!%p24_p3) target bundleno = 8 (0x8), region = 114 }
 0xa27   :  { %1351 = vsyncpa [#allocation3], 1 }
 0xa28   :  { %1353 = vsyncpa [#allocation3 + $0x1], 1 }

</bundles_post_ra>
